<compile_context>
chip_gen: v6e
topology: v6e:2x2x1
jax: 0.10.0
libtpu: 0.0.40
codegen_flags: <defaults>
</compile_context>

<pallas_src>
import jax
import jax.numpy as jnp
from jax.experimental import pallas as pl
from jax.experimental.pallas import tpu as pltpu

IN_FEATURES = 100
HIDDEN = 200
OUT_FEATURES = 10

# Lane-aligned (padded) dims used inside the kernel.
HID_PAD = 256
OUT_PAD = 128

_NEG_BIG = jnp.float32(-1e30)   # bias for padded output lanes -> softmax prob == 0
_TILE_ROWS = 16                 # bf16 output sublane-pack friendly tile granule


def _round_up(x, m):
    return (x + m - 1) // m * m


def tiny_model_kernel(x_ref, w1_ref, b1_ref, w2_ref, b2_ref, o_ref):
    # f32 -> bf16 cast of the streamed activations rides the idle VPU slot.
    x = x_ref[...].astype(jnp.bfloat16)                        # (TB, 100)
    # linear1 on the MXU: (TB,100) @ (100,256) with f32 accumulation.
    h = jnp.dot(x, w1_ref[...], preferred_element_type=jnp.float32)
    # bias + ReLU in f32 on the VPU (v5e has no bf16 VPU/EUP).
    h = jnp.maximum(h + b1_ref[...], 0.0)
    # linear2: (TB,256) @ (256,128) with f32 accumulation.
    logits = jnp.dot(h.astype(jnp.bfloat16), w2_ref[...],
                     preferred_element_type=jnp.float32)
    # b2 carries -1e30 in the 118 padded lanes -> exp underflows to exactly 0.
    logits = logits + b2_ref[...]
    # Softmax over the feature axis (torch.nn.Softmax() on 2-D input -> dim=1).
    m = jnp.max(logits, axis=-1, keepdims=True)
    e = jnp.exp(logits - m)
    denom = jnp.sum(e, axis=-1, keepdims=True)
    # Exact normalization (cost is negligible; kernel is HBM-bound), bf16 store.
    o_ref[...] = (e / denom).astype(o_ref.dtype)


def prepare_params(w1, b1, w2, b2):
    """One-time weight padding / bf16 pre-cast (hoist out of the hot path)."""
    w1_p = (jnp.zeros((IN_FEATURES, HID_PAD), jnp.float32)
            .at[:, :HIDDEN].set(w1).astype(jnp.bfloat16))
    b1_p = jnp.zeros((1, HID_PAD), jnp.float32).at[0, :HIDDEN].set(b1)
    w2_p = (jnp.zeros((HID_PAD, OUT_PAD), jnp.float32)
            .at[:HIDDEN, :OUT_FEATURES].set(w2).astype(jnp.bfloat16))
    b2_p = jnp.full((1, OUT_PAD), _NEG_BIG, jnp.float32).at[0, :OUT_FEATURES].set(b2)
    return w1_p, b1_p, w2_p, b2_p


def _pick_tile(b_pad, block_b):
    """Largest multiple of _TILE_ROWS that divides b_pad, capped so the grid has
    >= 2 tiles (keeps both v7x TensorCores busy)."""
    tb = min(block_b, b_pad)
    if b_pad >= 2 * _TILE_ROWS:
        tb = min(tb, b_pad // 2)
    tb = max(_TILE_ROWS, (tb // _TILE_ROWS) * _TILE_ROWS)
    while b_pad % tb != 0:          # terminates: _TILE_ROWS always divides b_pad
        tb -= _TILE_ROWS
    return tb


def _spec(shape, index_map, buffers=None):
    if buffers is None or buffers <= 2:
        return pl.BlockSpec(shape, index_map)
    return pl.BlockSpec(shape, index_map, pipeline_mode=pl.Buffered(buffers))


def tiny_model_forward_padded(x, params, *, block_b=1024):
    """Returns the padded (B_pad, 128) bf16 probability buffer.

    Columns >= 10 are exactly 0 and rows >= B are padding; perf-sensitive
    consumers should slice lazily (or fuse) instead of materializing a copy.
    """
    w1_p, b1_p, w2_p, b2_p = params
    B = x.shape[0]
    B_pad = _round_up(B, _TILE_ROWS)
    if B_pad != B:   # <= 15 rows of padding; zero-copy when B is already aligned
        x = jnp.zeros((B_pad, IN_FEATURES), x.dtype).at[:B].set(x)

    TB = _pick_tile(B_pad, block_b)
    num_tiles = B_pad // TB
    # Deeper buffering only pays off when the grid is deep enough to pipeline.
    stream_buffers = 3 if num_tiles >= 3 else None

    out = pl.pallas_call(
        tiny_model_kernel,
        out_shape=jax.ShapeDtypeStruct((B_pad, OUT_PAD), jnp.bfloat16),
        grid=(num_tiles,),
        in_specs=[
            _spec((TB, IN_FEATURES), lambda i: (i, 0), stream_buffers),   # x: streamed
            pl.BlockSpec((IN_FEATURES, HID_PAD), lambda i: (0, 0)),       # w1: resident
            pl.BlockSpec((1, HID_PAD), lambda i: (0, 0)),                 # b1: resident
            pl.BlockSpec((HID_PAD, OUT_PAD), lambda i: (0, 0)),           # w2: resident
            pl.BlockSpec((1, OUT_PAD), lambda i: (0, 0)),                 # b2: resident
        ],
        out_specs=_spec((TB, OUT_PAD), lambda i: (i, 0), stream_buffers),  # lane-dense
        compiler_params=pltpu.CompilerParams(
            dimension_semantics=("parallel",)),   # batch tiles shard across TCs on v7x
    )(x, w1_p, b1_p, w2_p, b2_p)
    return out


def tiny_model_forward(x, w1, b1, w2, b2, *, block_b=1024):
    """Convenience wrapper returning the logical (B, 10) probabilities (bf16)."""
    params = prepare_params(w1, b1, w2, b2)
    out = tiny_model_forward_padded(x, params, block_b=block_b)
    # For maximum end-to-end bandwidth, consume the padded buffer directly; this
    # slice is kept only for API convenience / the reference check below.
    return out[:x.shape[0], :OUT_FEATURES]


def init_params(key):
    # Deterministic synthetic init mirroring nn.Linear's U(-1/sqrt(fan_in), 1/sqrt(fan_in)).
    k1, k2, k3, k4 = jax.random.split(key, 4)
    bound1 = 1.0 / jnp.sqrt(jnp.float32(IN_FEATURES))
    bound2 = 1.0 / jnp.sqrt(jnp.float32(HIDDEN))
    w1 = jax.random.uniform(k1, (IN_FEATURES, HIDDEN), jnp.float32, -bound1, bound1)
    b1 = jax.random.uniform(k2, (HIDDEN,), jnp.float32, -bound1, bound1)
    w2 = jax.random.uniform(k3, (HIDDEN, OUT_FEATURES), jnp.float32, -bound2, bound2)
    b2 = jax.random.uniform(k4, (OUT_FEATURES,), jnp.float32, -bound2, bound2)
    return w1, b1, w2, b2


if __name__ == "__main__":
    key = jax.random.PRNGKey(0)
    kx, kp = jax.random.split(key)
    batch = 32   # small; yields a 2-tile parallel grid (TB=16)
    x = jax.random.uniform(kx, (batch, IN_FEATURES), jnp.float32)
    w1, b1, w2, b2 = init_params(kp)

    out = tiny_model_forward(x, w1, b1, w2, b2)
    out = jax.block_until_ready(out)

    # Sanity: shape (batch, 10), softmax rows sum to ~1 (bf16 output -> loose atol).
    assert out.shape == (batch, OUT_FEATURES)
    out_f32 = out.astype(jnp.float32)
    assert jnp.allclose(jnp.sum(out_f32, axis=-1), 1.0, atol=2e-2)

    # Cross-check against plain-JAX f32 reference (bf16 MXU operands + bf16 output
    # -> relaxed tolerance).
    ref_h = jnp.maximum(x @ w1 + b1, 0.0)
    ref = jax.nn.softmax(ref_h @ w2 + b2, axis=-1)
    assert jnp.allclose(out_f32, ref, atol=3e-2)

    print("KERNEL_OK")
</pallas_src>

<mosaic_0001>
module attributes {stable_mosaic.version = 11 : i64} {
  func.func @tiny_model_kernel(%arg0: i32, %arg1: memref<16x100xf32, #tpu.memory_space<vmem>>, %arg2: memref<100x256xbf16, #tpu.memory_space<vmem>>, %arg3: memref<1x256xf32, #tpu.memory_space<vmem>>, %arg4: memref<256x128xbf16, #tpu.memory_space<vmem>>, %arg5: memref<1x128xf32, #tpu.memory_space<vmem>>, %arg6: memref<16x128xbf16, #tpu.memory_space<vmem>>) attributes {dimension_semantics = [#tpu.dimension_semantics<parallel>], iteration_bounds = array<i64: 2>, scalar_prefetch = 0 : i64, scratch_operands = 0 : i64, tpu.core_type = #tpu.core_type<tc>, window_params = [{transform_indices = @transform_0, window_bounds = array<i64: 16, 100>}, {pipeline_mode = #tpu.pipeline_mode<synchronous>, transform_indices = @transform_1, window_bounds = array<i64: 100, 256>}, {pipeline_mode = #tpu.pipeline_mode<synchronous>, transform_indices = @transform_2, window_bounds = array<i64: 1, 256>}, {pipeline_mode = #tpu.pipeline_mode<synchronous>, transform_indices = @transform_3, window_bounds = array<i64: 256, 128>}, {pipeline_mode = #tpu.pipeline_mode<synchronous>, transform_indices = @transform_4, window_bounds = array<i64: 1, 128>}, {transform_indices = @transform_5, window_bounds = array<i64: 16, 128>}]} {
    %c0 = arith.constant 0 : index
    %c0_0 = arith.constant 0 : index
    %0 = vector.load %arg1[%c0, %c0_0] : memref<16x100xf32, #tpu.memory_space<vmem>>, vector<16x100xf32>
    %1 = arith.truncf %0 : vector<16x100xf32> to vector<16x100xbf16>
    %c0_1 = arith.constant 0 : index
    %c0_2 = arith.constant 0 : index
    %2 = vector.load %arg2[%c0_1, %c0_2] : memref<100x256xbf16, #tpu.memory_space<vmem>>, vector<100x256xbf16>
    %cst = arith.constant dense<0.000000e+00> : vector<16x256xf32>
    %3 = tpu.matmul %1, %2, %cst {dimension_numbers = #tpu.dot_dimension_numbers<[1], [0], [0], [1], [0, 0, 1, 1], [], []>} : vector<16x100xbf16>, vector<100x256xbf16>, vector<16x256xf32> -> vector<16x256xf32>
    %c0_3 = arith.constant 0 : index
    %c0_4 = arith.constant 0 : index
    %4 = vector.load %arg3[%c0_3, %c0_4] : memref<1x256xf32, #tpu.memory_space<vmem>>, vector<1x256xf32>
    %5 = vector.broadcast %4 : vector<1x256xf32> to vector<16x256xf32>
    %6 = arith.addf %3, %5 : vector<16x256xf32>
    %cst_5 = arith.constant 0.000000e+00 : f32
    %7 = vector.broadcast %cst_5 : f32 to vector<16x256xf32>
    %8 = arith.maximumf %6, %7 : vector<16x256xf32>
    %9 = arith.truncf %8 : vector<16x256xf32> to vector<16x256xbf16>
    %c0_6 = arith.constant 0 : index
    %c0_7 = arith.constant 0 : index
    %10 = vector.load %arg4[%c0_6, %c0_7] : memref<256x128xbf16, #tpu.memory_space<vmem>>, vector<256x128xbf16>
    %cst_8 = arith.constant dense<0.000000e+00> : vector<16x128xf32>
    %11 = tpu.matmul %9, %10, %cst_8 {dimension_numbers = #tpu.dot_dimension_numbers<[1], [0], [0], [1], [0, 0, 1, 1], [], []>} : vector<16x256xbf16>, vector<256x128xbf16>, vector<16x128xf32> -> vector<16x128xf32>
    %c0_9 = arith.constant 0 : index
    %c0_10 = arith.constant 0 : index
    %12 = vector.load %arg5[%c0_9, %c0_10] : memref<1x128xf32, #tpu.memory_space<vmem>>, vector<1x128xf32>
    %13 = vector.broadcast %12 : vector<1x128xf32> to vector<16x128xf32>
    %14 = arith.addf %11, %13 : vector<16x128xf32>
    %cst_11 = arith.constant dense<0xFF800000> : vector<16xf32>
    %15 = vector.multi_reduction <maximumf>, %14, %cst_11 [1] : vector<16x128xf32> to vector<16xf32>
    %16 = vector.shape_cast %15 : vector<16xf32> to vector<16x1xf32>
    %17 = vector.broadcast %16 : vector<16x1xf32> to vector<16x128xf32>
    %18 = arith.subf %14, %17 : vector<16x128xf32>
    %19 = math.exp %18 : vector<16x128xf32>
    %cst_12 = arith.constant dense<0.000000e+00> : vector<16xf32>
    %20 = vector.multi_reduction <add>, %19, %cst_12 [1] : vector<16x128xf32> to vector<16xf32>
    %21 = vector.shape_cast %20 : vector<16xf32> to vector<16x1xf32>
    %22 = vector.broadcast %21 : vector<16x1xf32> to vector<16x128xf32>
    %23 = arith.divf %19, %22 : vector<16x128xf32>
    %24 = arith.truncf %23 : vector<16x128xf32> to vector<16x128xbf16>
    %c0_13 = arith.constant 0 : index
    %c0_14 = arith.constant 0 : index
    %25 = vector.load %arg6[%c0_13, %c0_14] : memref<16x128xbf16, #tpu.memory_space<vmem>>, vector<16x128xbf16>
    tpu.vector_store %arg6[%c0_13, %c0_14], %24 {strides = array<i32>} : memref<16x128xbf16, #tpu.memory_space<vmem>>, vector<16x128xbf16>,
    return
  }
  func.func @transform_0(%arg0: i32) -> (i32, i32) {
    %c0_i32 = arith.constant 0 : i32
    %c0_i32_0 = arith.constant 0 : i32
    return %arg0, %c0_i32 : i32, i32
  }
  func.func @transform_1(%arg0: i32) -> (i32, i32) {
    %c0_i32 = arith.constant 0 : i32
    %c0_i32_0 = arith.constant 0 : i32
    %c0_i32_1 = arith.constant 0 : i32
    return %c0_i32, %c0_i32_0 : i32, i32
  }
  func.func @transform_2(%arg0: i32) -> (i32, i32) {
    %c0_i32 = arith.constant 0 : i32
    %c0_i32_0 = arith.constant 0 : i32
    %c0_i32_1 = arith.constant 0 : i32
    return %c0_i32, %c0_i32_0 : i32, i32
  }
  func.func @transform_3(%arg0: i32) -> (i32, i32) {
    %c0_i32 = arith.constant 0 : i32
    %c0_i32_0 = arith.constant 0 : i32
    %c0_i32_1 = arith.constant 0 : i32
    return %c0_i32, %c0_i32_0 : i32, i32
  }
  func.func @transform_4(%arg0: i32) -> (i32, i32) {
    %c0_i32 = arith.constant 0 : i32
    %c0_i32_0 = arith.constant 0 : i32
    %c0_i32_1 = arith.constant 0 : i32
    return %c0_i32, %c0_i32_0 : i32, i32
  }
  func.func @transform_5(%arg0: i32) -> (i32, i32) {
    %c0_i32 = arith.constant 0 : i32
    %c0_i32_0 = arith.constant 0 : i32
    return %arg0, %c0_i32 : i32, i32
  }
}

</mosaic_0001>

<bundles_post_ra>
// kernel: tpu_custom_call.1
= control target key start
LH: loop header
LB: loop body
LE: loop exit
PB: predicated region body
PF: predicated region fallthrough
CT: control target
= control target key end

     0   :  { %10 = vsyncpa [#allocation3], 0  ;;  %s1336_s0 = inlined_call_operand.hbm [shape: f32[32,100], index: 0, kind: input, shape index: {}]   ;;  %s1337_s1 = inlined_call_operand.hbm [shape: bf16[100,256], index: 1, kind: input, shape index: {}]   ;;  %s1338_s2 = inlined_call_operand.vmem [shape: f32[1,256], index: 2, kind: input, shape index: {}]   ;;  %s1339_s3 = inlined_call_operand.hbm [shape: bf16[256,128], index: 3, kind: input, shape index: {}]   ;;  %s1340_s4 = inlined_call_operand.vmem [shape: f32[1,128], index: 4, kind: input, shape index: {}]   ;;  %s1341_s5 = inlined_call_operand.hbm [shape: bf16[32,128], index: 5, kind: output, shape index: {}]  }
   0x1   :  { %12 = vsyncpa [#allocation3 + $0x1], 0 }
   0x2   :  { %13 = vsyncpa [#allocation6], 0 }
   0x3   :  { %14 = vsyncpa [#allocation4], 0 }
   0x4   :  { %16 = vsyncpa [#allocation4 + $0x1], 0  ;;  %s1131_s18 = smov 0   ;;  %s1133_s19 = smov 0  }
   0x5   :  { %s1135_s20 = smov 0   ;;  %s1137_s21 = smov 0  }
   0x6 LB: > { %s1152_s22 = sadd.s32 4294967295, %s1088_s21   ;;  %s738_s23 = sadd.s32 4294967294, %s1088_s21   ;;  %s1088_s21 = sphi %s1137_s21, %s1364_s21   ;;  %s1084_s20 = sphi %s1135_s20, %s1363_s20   ;;  %s1080_s19 = sphi %s1133_s19, %s1362_s19   ;;  %s1076_s18 = sphi %s1131_s18, %s1361_s18  }
   0x7   : > { %p42_p0 = scmp.ne.s32.totalorder %s1080_s19, %s1076_s18  ;;  %p1342_p1 = scmp.eq.s32.totalorder %s1152_s22, 0 }
   0x8   : > { %p150_p2 = scmp.eq.s32.totalorder %s1152_s22, 1  ;;  %p156_p3 = scmp.eq.s32.totalorder %s738_s23, 1 }
   0x9   : > { %p1161_p4 = por %p1342_p1, %p42_p0  ;;  %p739_p5 = scmp.ge.s32.totalorder %s1088_s21, 1 }
   0xa   : > { %p1166_p6 = por %p156_p3, %p42_p0  ;;  %p163_p7 = scmp.lt.s32.totalorder %s1088_s21, 3 }
   0xb   : > { %s1347_s24 = scalar_select %p1161_p4, 1, 0 }
   0xc   : > { %s1348_s25 = scalar_select %p1166_p6, 1, 0 }
   0xd   : > { %p1171_p8 = pnand %p739_p5, %p163_p7  ;;  %s1090_s27 = smov [#allocation5]  }
   0xe   : > { %s175_s28 = sshll.u32 %s1090_s27, 4  ;;  %s1091_s30 = smov [#allocation7]   ;;  %s176_s28 = int_to_ptr.vmem [resolvable:$true] %s175_s28 }
   0xf   : > { %s1349_s26 = scalar_select %p1171_p8, 1, 0 }
  0x10   : > { %p834_p9 = pneg %p1171_p8  ;;  %s191_s6 = sshll.u32 %s1091_s30, 4  ;;  %s192_s6 = int_to_ptr.vmem [resolvable:$true] %s191_s6 }
  0x11   : > { %s951_s7 = scalar_lea.vmem %s176_s28, 1664  ;;  %p959_p5 = scmp.lt.s32.totalorder %s176_s28, %s176_s28 }
  0x12   : > { %p1180_p11 = pnand %p834_p9, %p1342_p1  ;;  %p952_p13 = scmp.ne.s32.totalorder %s176_s28, %s951_s7 }
  0x13   : > { %p960_p7 = scmp.lt.s32.totalorder %s951_s7, %s951_s7 }
  0x14   : > { %p942_p12 = pneg %p1180_p11 }
  0x15   : > { %p961_p10 = por %p960_p7, %p959_p5 }
  0x16   : > { %p954_p0 = pnand %p952_p13, %p942_p12 }
  0x18   : > { %p955_p3 = pneg %p954_p0 }
  0x1a   : > { %p962_p9 = pnand %p961_p10, %p955_p3 }
  0x1c   : > { %965 = shalt.err (!%p962_p9)
}
  0x1d   : > { %s1343_s8 = smov 128   ;;  %s1093_s9 = smov 8  }
  0x1e   : > { %837 = dma.hbm_to_vmem [thread:$0]  (!%p1180_p11), %s1337_s1, 1664, %s176_s28, [#allocation6], %s1343_s8, %s1343_s8, %s1093_s9  }
  0x1f   : > { %s977_s12 = scalar_lea.vmem %s192_s6, 2048  ;;  %p985_p10 = scmp.lt.s32.totalorder %s192_s6, %s192_s6 }
  0x20   : > { %p978_p13 = scmp.ne.s32.totalorder %s192_s6, %s977_s12  ;;  %p986_p3 = scmp.lt.s32.totalorder %s977_s12, %s977_s12 }
  0x22   : > { %p980_p0 = pnand %p978_p13, %p942_p12  ;;  %p987_p7 = por %p986_p3, %p985_p10 }
  0x24   : > { %p981_p5 = pneg %p980_p0 }
  0x26   : > { %p988_p9 = pnand %p987_p7, %p981_p5 }
  0x28   : > { %991 = shalt.err (!%p988_p9)
}
  0x29   : > { %s1094_s13 = smov 64   ;;  %s1095_s14 = smov 4  }
  0x2a   : > { %840 = dma.hbm_to_vmem [thread:$0]  (!%p1180_p11), %s1339_s3, 2048, %s192_s6, [#allocation6], %s1094_s13, %s1094_s13, %s1095_s14  }
  0x2b   : > { %s1206_s17 = sadd.s32 1, %s1088_s21   ;;  %s29_s27 = sadd.s32 1, %s1084_s20 }
  0x2c   : > { %s26_s23 = ssub.s32 %s1088_s21, %s1206_s17  ;;  %p36_p13 = scmp.ne.s32.totalorder %s1084_s20, %s1080_s19 }
  0x2d   : > { %p27_p12 = scmp.eq.s32.totalorder %s26_s23, 0  ;;  %p37_p0 = scmp.eq.s32.totalorder %s1088_s21, 0 }
  0x2e   : > { %p1219_p10 = por %p150_p2, %p36_p13  ;;  %p851_p3 = scmp.lt.s32.totalorder %s1088_s21, 2 }
  0x2f   : > { %s1215_s28 = scalar_select %p27_p12, %s1084_s20, %s29_s27  }
  0x30   : > { %p38_p5 = por %p37_p0, %p36_p13  ;;  %s208_s29 = sand.u32 1, %s1084_s20  }
  0x31   : > { %s1351_s30 = scalar_select %p1219_p10, 1, 0 }
  0x32   : > { %s743_s7 = sshll.u32 %s208_s29, 4  ;;  %s791_s6 = sshll.u32 %s1088_s21, 8 }
  0x33   : > { %s1229_s12 = scalar_lea.hbm %s1336_s0, %s791_s6  ;;  %s212_s13 = scalar_lea.vmem [#allocation2], %s743_s7 }
  0x34   : > { %s219_s14 = sshll.u32 %s212_s13, 4  ;;  %p1233_p2 = pnand %p851_p3, %p38_p5  ;;  %s1231_s14 = int_to_ptr.vmem [resolvable:$true] %s219_s14 }
  0x35   : > { %s1237_s16 = scalar_lea.sflag [#allocation3], %s208_s29  ;;  %s992_s23 = scalar_lea.hbm %s1229_s12, 256 }
  0x36   : > { %p993_p11 = scmp.ne.s32.totalorder %s1229_s12, %s992_s23  ;;  %p994_p7 = pneg %p1233_p2 }
  0x37   : > { %s997_s7 = scalar_lea.hbm %s1336_s0, 512  ;;  %p998_p13 = scmp.lt.s32.totalorder %s1229_s12, %s1336_s0 }
  0x38   : > { %p995_p9 = pnand %p994_p7, %p993_p11  ;;  %p999_p0 = scmp.lt.s32.totalorder %s997_s7, %s992_s23 }
  0x3a   : > { %p996_p12 = pneg %p995_p9  ;;  %p1000_p5 = por %p999_p0, %p998_p13 }
  0x3c   : > { %p1001_p3 = pnand %p1000_p5, %p996_p12 }
  0x3e   : > { %1004 = shalt.err (!%p1001_p3)
}
  0x3f   : > { %s1005_s29 = scalar_lea.vmem %s1231_s14, 256  ;;  %s1096_s13 = smov [#allocation2]  }
  0x40   : > { %p1006_p1 = scmp.ne.s32.totalorder %s1231_s14, %s1005_s29  ;;  %s1010_s8 = sshll.u32 %s1096_s13, 4  ;;  %s1011_s8 = int_to_ptr.vmem [resolvable:$false] %s1010_s8 }
  0x41   : > { %s1012_s27 = scalar_lea.vmem %s1011_s8, 512  ;;  %p1013_p9 = scmp.lt.s32.totalorder %s1231_s14, %s1011_s8 }
  0x42   : > { %p1008_p6 = pnand %p1006_p1, %p994_p7  ;;  %p1014_p10 = scmp.lt.s32.totalorder %s1012_s27, %s1005_s29 }
  0x44   : > { %p1009_p11 = pneg %p1008_p6  ;;  %p1015_p4 = por %p1014_p10, %p1013_p9 }
  0x46   : > { %p1016_p8 = pnand %p1015_p4, %p1009_p11 }
  0x48   : > { %1019 = shalt.err (!%p1016_p8)
}
  0x49   : > { %s1353_s23 = smov 128   ;;  %p1354_p1 = scmp.ne.s32.totalorder %s1349_s26, 0 }
  0x4a   : > { %844 = dma.hbm_to_vmem [thread:$0]  (!%p1233_p2), %s1229_s12, 256, %s1231_s14, %s1237_s16, %s1353_s23, %s1353_s23, %s1093_s9  }
  0x4b   : > { %231 = sbr.rel (%p1354_p1) target bundleno = 850 (0x352), region = 40  ;;  %s1264_s6 = sand.u32 (!%p1354_p1), 1, %s1080_s19  }
  0x4c   : > { %s747_s8 = sshll.u32 (!%p1354_p1), %s1264_s6, 4  ;;  %s234_s7 = scalar_lea.sflag (!%p1354_p1), [#allocation3], %s1264_s6 }
  0x4d   : > { %s1268_s10 = scalar_lea.vmem (!%p1354_p1), [#allocation2], %s747_s8  ;;  %p1355_p4 = scmp.ne.s32.totalorder (!%p1354_p1), %s1347_s24, 0 }
  0x50   : > { %1063 = dma.done.wait (%p1355_p4), %s234_s7, 256  }
  0x51   : > { %1065 = vsyncadd (%p1355_p4), %s234_s7, 4294967040  ;;  %p1356_p6 = scmp.eq.s32.totalorder %s1152_s22, 0 }
  0x53   : > { %1067 = dma.done.wait (%p1356_p6), [#allocation6], 3712   ;;  %p1357_p8 = pmov %p1356_p6 }
  0x54   : > { %v1097_v0 = vmov 0   ;;  %v290_v1 = vld [vmem:[#allocation5 + $0x60] sm:$0x33]  ;;  %vm372_vm0 = vcmask 1041408   ;;  %v898_v4 = vld [vmem:[#allocation5 + $0x54] ss:$8 sps:$4 sm:$0xff]   ;;  %v293_v36 = vlaneseq }
  0x55   : > { %1069 = vsyncadd (%p1357_p8), [#allocation6], 4294963584  ;;  %411 = vmatprep.mubr.bf16.mxu0 %v1097_v0  ;;  %v764_v2 = vcombine.high %v290_v1, %v290_v1  ;;  %v763_v3 = vcombine.low %v290_v1, %v290_v1  ;;  %v900_v6 = vld [vmem:[#allocation5 + $0x50] ss:$8 sps:$4 sm:$0xff]   ;;  %v901_v7 = vld [vmem:[#allocation5 + $0x44] ss:$8 sps:$4 sm:$0xff]  }
  0x56   : > { %v903_v8 = vld [vmem:[#allocation5 + $0x40] ss:$8 sps:$4 sm:$0xff]   ;;  %v904_v9 = vld [vmem:[#allocation5 + $0x34] ss:$8 sps:$4 sm:$0xff]   ;;  %v906_v11 = vld [vmem:[#allocation5 + $0x30] ss:$8 sps:$4 sm:$0xff]  }
  0x57   : > { %765 = vmatprep.subr.msk.bf16.mxu0 %vm372_vm0, %v764_v2  ;;  %v374_v5 = vsel %vm372_vm0, %v763_v3, 0  ;;  %v916_v10 = vld [vmem:[#allocation7 + $0x78] sm:$0xff]   ;;  %v918_v14 = vld [vmem:[#allocation7 + $0x70] sm:$0xff]   ;;  %v920_v16 = vld [vmem:[#allocation7 + $0x68] sm:$0xff]   ;;  %vm368_vm1 = vcmask 818176   ;;  %v294_v37 = vshrl.u32 %v293_v36, 7 }
  0x58   : > { %382 = vmatpush1.bf16.msra.mxu0 %v374_v5  ;;  %v917_v12 = vld [vmem:[#allocation7 + $0x38] sm:$0xff]   ;;  %800 = vmatprep.subr.bf16.mxu1 %v916_v10  ;;  %v919_v15 = vld [vmem:[#allocation7 + $0x30] sm:$0xff]   ;;  %v921_v19 = vld [vmem:[#allocation7 + $0x28] sm:$0xff]   ;;  %s750_s14 = sshll.u32 %s1264_s6, 3  ;;  %s794_s15 = sshll.u32 %s1152_s22, 7 }
  0x59   : > { %383 = vmatprep.subr.bf16.mxu0 %v898_v4  ;;  %v907_v13 = vld [vmem:[#allocation5 + $0x24] ss:$8 sps:$4 sm:$0xff]   ;;  %801 = vmatpush3.bf16.msra.mxu1 %v917_v12  ;;  %v909_v17 = vld [vmem:[#allocation5 + $0x20] ss:$8 sps:$4 sm:$0xff]   ;;  %v910_v18 = vld [vmem:[#allocation5 + $0x14] ss:$8 sps:$4 sm:$0xff]   ;;  %s1291_s27 = scalar_lea.hbm %s1341_s5, %s794_s15 }
  0x5a   : > { %802 = vmatprep.subr.bf16.mxu1 %v918_v14  ;;  %v922_v20 = vld [vmem:[#allocation7 + $0x60] sm:$0xff]   ;;  %v912_v21 = vld [vmem:[#allocation5 + $0x10] ss:$8 sps:$4 sm:$0xff]   ;;  %v924_v24 = vld [vmem:[#allocation7 + $0x58] sm:$0xff]   ;;  %v299_v38 = vsub.s32 1, %v294_v37  ;;  %v295_v39 = vsub.s32 0, %v294_v37 }
  0x5b   : > { %v923_v22 = vld [vmem:[#allocation7 + $0x20] sm:$0xff]   ;;  %v275_v26 = vld [vmem:[%s1268_s10] sm:$0xff]  ;;  %v926_v30 = vld [vmem:[#allocation7 + $0x50] sm:$0xff]   ;;  %s271_s16 = scalar_lea.vmem [#allocation8], %s750_s14  ;;  %s633_s23 = scalar_lea.sflag [#allocation4], %s1264_s6 }
  0x5c   : > { %384 = vmatpush1.bf16.msra.mxu0 %v900_v6  ;;  %v913_v23 = vld [vmem:[#allocation5 + $0x4] ss:$8 sps:$4 sm:$0xff]   ;;  %v915_v25 = vld [vmem:[#allocation5] ss:$8 sps:$4 sm:$0xff]   ;;  %v927_v31 = vld [vmem:[#allocation7 + $0x10] sm:$0xff]   ;;  %s646_s11 = sshll.u32 %s271_s16, 4  ;;  %s1293_s11 = int_to_ptr.vmem [resolvable:$true] %s646_s11 }
  0x5d   : > { %385 = vmatprep.subr.bf16.mxu0 %v901_v7  ;;  %803 = vmatpush3.bf16.msra.mxu1 %v919_v15  ;;  %v276_v27 = vld [vmem:[%s1268_s10 + $0x8] sm:$0xff]  ;;  %v925_v28 = vld [vmem:[#allocation7 + $0x18] sm:$0xff]   ;;  %v928_v32 = vld [vmem:[#allocation7 + $0x48] sm:$0xff]   ;;  %s1020_s8 = scalar_lea.vmem %s1293_s11, 128  ;;  %p1358_p2 = scmp.ne.s32.totalorder %s1351_s30, 0 }
  0x5e   : > { %804 = vmatprep.subr.bf16.mxu1 %v920_v16  ;;  %v277_v29 = vpack.c.bf16 %v276_v27, %v275_v26  ;;  %v929_v33 = vld [vmem:[#allocation7 + $0x8] sm:$0xff]   ;;  %v930_v34 = vld [vmem:[#allocation7 + $0x40] sm:$0xff]   ;;  %v291_v40 = vld [vmem:[%s1338_s2] sm:$0x3]  ;;  %p1021_p10 = scmp.ne.s32.totalorder %s1293_s11, %s1020_s8  ;;  %s1098_s22 = smov [#allocation8]  }
  0x5f   : > { %v931_v35 = vld [vmem:[#allocation7] sm:$0xff]   ;;  %v300_v42 = vrot.slane %v291_v40, %v299_v38  ;;  %v296_v43 = vrot.slane %v291_v40, %v295_v39  ;;  %v767_v59 = vld [vmem:[%s1340_s4] ss:$0 sm:$0xff]  ;;  %s1024_s7 = sshll.u32 %s1098_s22, 4  ;;  %s1025_s7 = int_to_ptr.vmem [resolvable:$false] %s1024_s7 }
  0x60   : > { %386 = vmatpush1.bf16.msra.mxu0 %v903_v8  ;;  %p1022_p7 = pnand %p1021_p10, %p1358_p2  ;;  %s1026_s10 = scalar_lea.vmem %s1025_s7, 256 }
  0x61   : > { %387 = vmatprep.subr.bf16.mxu0 %v904_v9  ;;  %805 = vmatpush3.bf16.msra.mxu1 %v921_v19  ;;  %p1027_p13 = scmp.lt.s32.totalorder %s1293_s11, %s1025_s7  ;;  %p1028_p0 = scmp.lt.s32.totalorder %s1026_s10, %s1020_s8 }
  0x62   : > { %806 = vmatprep.subr.bf16.mxu1 %v922_v20  ;;  %p1023_p12 = pneg %p1022_p7 }
  0x63   : > { %p1029_p5 = por %p1028_p0, %p1027_p13 }
  0x64   : > { %388 = vmatpush1.bf16.msra.mxu0 %v906_v11 }
  0x65   : > { %389 = vmatprep.subr.bf16.mxu0 %v907_v13  ;;  %807 = vmatpush3.bf16.msra.mxu1 %v923_v22  ;;  %p1030_p3 = pnand %p1029_p5, %p1023_p12 }
  0x66   : > { %808 = vmatprep.subr.bf16.mxu1 %v924_v24 }
  0x68   : > { %390 = vmatpush1.bf16.msra.mxu0 %v909_v17 }
  0x69   : > { %391 = vmatprep.subr.bf16.mxu0 %v910_v18  ;;  %809 = vmatpush3.bf16.msra.mxu1 %v925_v28 }
  0x6a   : > { %810 = vmatprep.subr.bf16.mxu1 %v926_v30 }
  0x6c   : > { %392 = vmatpush1.bf16.msra.mxu0 %v912_v21 }
  0x6d   : > { %393 = vmatprep.subr.bf16.mxu0 %v913_v23  ;;  %811 = vmatpush3.bf16.msra.mxu1 %v927_v31 }
  0x6e   : > { %812 = vmatprep.subr.bf16.mxu1 %v928_v32 }
  0x70   : > { %394 = vmatpush1.bf16.msra.mxu0 %v915_v25 }
  0x71   : > { %813 = vmatpush3.bf16.msra.mxu1 %v929_v33 }
  0x72   : > { %814 = vmatprep.subr.bf16.mxu1 %v930_v34 }
  0x73   : > { %766 = vmatmul.mubr.msk.bf16.vlgmr.msra.gmra.mxu0 %vm368_vm1, %v277_v29 }
  0x75   : > { %815 = vmatpush3.bf16.msra.mxu1 %v931_v35 }
 0x133   : > { %v413_v41 = vpop.f32.mrf.mxu0 }
 0x134   : > { %v414_v48 = vadd.f32 %v413_v41, %v296_v43 }
 0x135   : > { %v415_v44 = vpop.f32.mrf.mxu0 }
 0x136   : > { %v416_v46 = vadd.f32 %v415_v44, %v300_v42  ;;  %v422_v54 = vmax.f32 %v414_v48, 0.0 }
 0x137   : > { %v417_v45 = vpop.f32.mrf.mxu0 }
 0x138   : > { %v418_v47 = vadd.f32 %v417_v45, %v296_v43  ;;  %v423_v52 = vmax.f32 %v416_v46, 0.0 }
 0x139   : > { %v419_v49 = vpop.f32.mrf.mxu0 }
 0x13a   : > { %v420_v50 = vadd.f32 %v419_v49, %v300_v42  ;;  %v424_v51 = vmax.f32 %v418_v47, 0.0 }
 0x13c   : > { %v425_v53 = vmax.f32 %v420_v50, 0.0  ;;  %v426_v56 = vpack.c.bf16 %v424_v51, %v422_v54 }
 0x13e   : > { %v427_v55 = vpack.c.bf16 %v425_v53, %v423_v52 }
 0x140   : > { %595 = vmatprep.mubr.bf16.mxu1 %v427_v55 }
 0x141   : > { %596 = vmatmul.mubr.bf16.vlgmr.msra.gmra.mxu1 %v426_v56 }
 0x201   : > { %v816_v57 = vpop.f32.mrf.mxu1 }
 0x203   : > { %v817_v58 = vpop.f32.mrf.mxu1 }
 0x204   : > { %v818_v60 = vadd.f32 %v817_v58, %v816_v57 }
 0x205   : > { %v819_v61 = vpop.f32.mrf.mxu1 }
 0x206   : > { %v598_v62 = vadd.f32 %v818_v60, %v767_v59 }
 0x207   : > { %v820_v63 = vpop.f32.mrf.mxu1 }
 0x208   : > { %v821_v0 = vadd.f32 %v820_v63, %v819_v61  ;;  %604 = vmax.xlane.f32.xlu0 %v598_v62 }
 0x20a   : > { %v601_v1 = vadd.f32 %v821_v0, %v767_v59 }
 0x20c   : > { %606 = vmax.xlane.f32.xlu0 %v601_v1 }
 0x291   : > { %v605_v2 = vpop.xlane.xlu0 %604 }
 0x292   : > { %v608_v3 = vsub.f32 %v598_v62, %v605_v2 }
 0x294   : > { %v610_v4 = vmul.f32 1.442695, %v608_v3 }
 0x295   : > { %v607_v5 = vpop.xlane.xlu0 %606 }
 0x296   : > { %932 = vpow2.f32 %v610_v4  ;;  %v609_v6 = vsub.f32 %v601_v1, %v607_v5 }
 0x298   : > { %v612_v7 = vmul.f32 1.442695, %v609_v6 }
 0x29a   : > { %934 = vpow2.f32 %v612_v7 }
 0x2a3   : > { %v933_v8 = vpop.eup %932 }
 0x2a4   : > { %614 = vadd.xlane.f32.xlu1 %v933_v8 }
 0x2a7   : > { %v935_v9 = vpop.eup %934 }
 0x2a8   : > { %616 = vadd.xlane.f32.xlu1 %v935_v9 }
 0x32d   : > { %v615_v10 = vpop.xlane.xlu1 %614 }
 0x32e   : > { %936 = vrcp.f32 %v615_v10 }
 0x331   : > { %v617_v11 = vpop.xlane.xlu1 %616 }
 0x332   : > { %938 = vrcp.f32 %v617_v11 }
 0x33b   : > { %v937_v12 = vpop.eup %936 }
 0x33c   : > { %v619_v14 = vmul.f32 %v937_v12, %v933_v8 }
 0x33f   : > { %v939_v13 = vpop.eup %938 }
 0x340   : > { %v621_v15 = vmul.f32 %v939_v13, %v935_v9 }
 0x342   : > { %v798_v16 = vpack.c.bf16 %v621_v15, %v619_v14 }
 0x344   : > { %799 = vst [vmem:[%s271_s16] sm:$0xff] %v798_v16  }
 0x345   : > { %1033 = shalt.err (!%p1030_p3)
}
 0x346   : > { %s1034_s24 = scalar_lea.hbm %s1291_s27, 128  ;;  %s1038_s12 = scalar_lea.hbm %s1341_s5, 256 }
 0x347   : > { %p1035_p11 = scmp.ne.s32.totalorder %s1291_s27, %s1034_s24  ;;  %p1039_p4 = scmp.lt.s32.totalorder %s1291_s27, %s1341_s5 }
 0x348   : > { %p1040_p6 = scmp.lt.s32.totalorder %s1038_s12, %s1034_s24 }
 0x349   : > { %p1036_p9 = pnand %p1035_p11, %p1358_p2 }
 0x34a   : > { %p1041_p8 = por %p1040_p6, %p1039_p4 }
 0x34b   : > { %p1037_p1 = pneg %p1036_p9 }
 0x34d   : > { %p1042_p10 = pnand %p1041_p8, %p1037_p1 }
 0x34f   : > { %1045 = shalt.err (!%p1042_p10)
}
 0x350   : > { %s1099_s16 = smov 64   ;;  %s1100_s29 = smov 4  }
 0x351   : > { %832 = dma.vmem_to_hbm [thread:$0]  (%p1358_p2), %s1293_s11, 128, %s1291_s27, %s633_s23, %s1099_s16, %s1099_s16, %s1100_s29  }
 0x352 PF: > { %s661_s13 = sand.u32 1, %s1076_s18   ;;  %p1359_p7 = scmp.ne.s32.totalorder %s1348_s25, 0 }
 0x353   : > { %p1360_p12 = scmp.ge.s32.totalorder %s1088_s21, 2  ;;  %s662_s8 = scalar_lea.sflag [#allocation4], %s661_s13 }
 0x355   : > { %p846_p13 = pnand %p1360_p12, %p1359_p7 }
 0x357   : > { %p847_p0 = pneg %p846_p13 }
 0x359   : > { %1071 = dma.done.wait (%p847_p0), %s662_s8, 128  }
 0x35a   : > { %1073 = vsyncadd (%p847_p0), %s662_s8, 4294967168  ;;  %p19_p5 = scmp.ge.s32.totalorder %s1206_s17, 4   ;;  %s1361_s18 = smov %s1080_s19 }
 0x35b   : > { %s1362_s19 = smov %s1084_s20  ;;  %s1363_s20 = smov %s1215_s28 }
 0x35c   : > { %s1364_s21 = smov %s1206_s17  ;;  %21 = sbr.rel (!%p19_p5) target bundleno = 6 (0x6), region = 93 }
 0x361   :  { %667 = vsyncpa [#allocation3], 1 }
 0x362   :  { %669 = vsyncpa [#allocation3 + $0x1], 1 }
 0x363   :  { %670 = vsyncpa [#allocation6], 1 }
 0x364   :  { %671 = vsyncpa [#allocation4], 1 }
 0x365   :  { %673 = vsyncpa [#allocation4 + $0x1], 1 }

</bundles_post_ra>
